<compile_context>
chip_gen: v6e
topology: v6e:2x2x1
jax: 0.10.0
libtpu: 0.0.40
codegen_flags: <defaults>
</compile_context>

<pallas_src>
import jax
import jax.numpy as jnp
from jax.experimental import pallas as pl
from jax.experimental.pallas import tpu as pltpu


def _round_up(a, m):
    return ((a + m - 1) // m) * m


def _softmax_lanes(logits):
    # Softmax over the lane (last) axis; approx reciprocal runs on the EUP slot.
    m = jnp.max(logits, axis=-1, keepdims=True)
    e = jnp.exp(logits - m)
    inv = pl.reciprocal(jnp.sum(e, axis=-1, keepdims=True), approx=True)
    return e * inv


def _policy_batched_kernel(x_ref, w1_ref, b1_ref, w2_ref, b2_ref, o_ref):
    # x_ref: (TB, n1)    w1_ref: (n1, n2p)   b1_ref: (1, n2p)
    # w2_ref: (n2p, n3p) b2_ref: (1, n3p)    o_ref: (TB, n3p)
    h = jnp.tanh(
        jnp.dot(x_ref[...], w1_ref[...], preferred_element_type=jnp.float32)
        + b1_ref[...])
    logits = jnp.dot(h, w2_ref[...], preferred_element_type=jnp.float32) + b2_ref[...]
    o_ref[...] = _softmax_lanes(logits)


def _policy_onehot_kernel(idx_ref, w1_ref, b1_ref, w2_ref, b2_ref, o_ref):
    # One-hot input: the first Linear reduces to picking row idx of W1.
    # Select + sublane reduction stays on safe VPU/XLU paths (no M=1 MXU matmul).
    n1, n2p = w1_ref.shape
    rows = jax.lax.broadcasted_iota(jnp.int32, (n1, n2p), 0)
    h_pre = jnp.sum(jnp.where(rows == idx_ref[0], w1_ref[...], 0.0),
                    axis=0, keepdims=True)
    h = jnp.tanh(h_pre + b1_ref[...])
    logits = jnp.dot(h, w2_ref[...], preferred_element_type=jnp.float32) + b2_ref[...]
    o_ref[...] = _softmax_lanes(logits)


def prepare_params(w1, b1, w2, b2):
    """One-time parameter preparation (cast / reshape / lane-pad).

    w1: (n1, n2), b1: (n2,), w2: (n2, n3), b2: (n3,) -- weights stored (in, out),
    i.e. transposed vs. PyTorch's (out, in).
      * hidden dim n2 is padded to a multiple of 128 lanes with zero weights/bias
        (padded units: tanh(0)=0 and zero W2 rows -> no effect on logits);
      * action dim n3 is padded to a multiple of 128 lanes; padded logits get a
        bias of -1e30 so their softmax probabilities are exactly 0.
    """
    n1, n2 = w1.shape
    n3 = w2.shape[1]
    n2p = _round_up(n2, 128)
    n3p = _round_up(n3, 128)

    w1p = jnp.zeros((n1, n2p), jnp.float32).at[:, :n2].set(w1.astype(jnp.float32))
    b1p = jnp.zeros((1, n2p), jnp.float32).at[:, :n2].set(
        b1.reshape(1, n2).astype(jnp.float32))
    w2p = jnp.zeros((n2p, n3p), jnp.float32).at[:n2, :n3].set(w2.astype(jnp.float32))
    b2p = jnp.full((1, n3p), -1e30, jnp.float32).at[:, :n3].set(
        b2.reshape(1, n3).astype(jnp.float32))
    return {"w1p": w1p, "b1p": b1p, "w2p": w2p, "b2p": b2p,
            "n1": n1, "n2": n2, "n3": n3, "n2p": n2p, "n3p": n3p}


def policyparameter_forward(x, params, *, max_row_tile=256):
    """Forward pass.

    x: (n1,)   -> (n3,)   probabilities (softmax over the n3 logits, i.e. the
                           literal torch.softmax(dim=0) on a 1-D input), or
    x: (B, n1) -> (B, n3) per-row action probabilities; rows are tiled over the
                           grid while the weights stay resident in VMEM.
    """
    w1p, b1p, w2p, b2p = params["w1p"], params["b1p"], params["w2p"], params["b2p"]
    n1, n2p, n3, n3p = params["n1"], params["n2p"], params["n3"], params["n3p"]

    squeeze = (x.ndim == 1)
    xb = x.reshape(1, n1) if squeeze else x
    xb = xb.astype(jnp.float32)
    bsz = xb.shape[0]

    tile = min(_round_up(bsz, 8), max_row_tile)     # sublane multiple of 8
    bpad = _round_up(bsz, tile)
    if bpad != bsz:
        xb = jnp.pad(xb, ((0, bpad - bsz), (0, 0)))

    out = pl.pallas_call(
        _policy_batched_kernel,
        out_shape=jax.ShapeDtypeStruct((bpad, n3p), jnp.float32),
        grid_spec=pltpu.PrefetchScalarGridSpec(
            num_scalar_prefetch=0,
            grid=(bpad // tile,),
            in_specs=[
                pl.BlockSpec((tile, n1), lambda i: (i, 0)),    # x rows stream
                pl.BlockSpec((n1, n2p), lambda i: (0, 0)),     # weights resident
                pl.BlockSpec((1, n2p), lambda i: (0, 0)),
                pl.BlockSpec((n2p, n3p), lambda i: (0, 0)),
                pl.BlockSpec((1, n3p), lambda i: (0, 0)),
            ],
            out_specs=pl.BlockSpec((tile, n3p), lambda i: (i, 0)),
        ),
        compiler_params=pltpu.CompilerParams(
            dimension_semantics=("parallel",)),  # lets v7x shard rows across TCs
    )(xb, w1p, b1p, w2p, b2p)

    out = out[:bsz, :n3]
    return out[0] if squeeze else out


def policyparameter_forward_onehot(state_idx, params):
    """Fast path when x is the one-hot encoding of `state_idx` (FrozenLake state).

    The state index is scalar-prefetched into SMEM and the first matmul is
    replaced by selecting the corresponding row of W1.
    """
    w1p, b1p, w2p, b2p = params["w1p"], params["b1p"], params["w2p"], params["b2p"]
    n1, n2p, n3, n3p = params["n1"], params["n2p"], params["n3"], params["n3p"]

    idx = jnp.asarray(state_idx, jnp.int32).reshape(1)

    out = pl.pallas_call(
        _policy_onehot_kernel,
        out_shape=jax.ShapeDtypeStruct((1, n3p), jnp.float32),
        grid_spec=pltpu.PrefetchScalarGridSpec(
            num_scalar_prefetch=1,
            grid=(1,),
            in_specs=[
                pl.BlockSpec((n1, n2p), lambda i, idx_ref: (0, 0)),
                pl.BlockSpec((1, n2p), lambda i, idx_ref: (0, 0)),
                pl.BlockSpec((n2p, n3p), lambda i, idx_ref: (0, 0)),
                pl.BlockSpec((1, n3p), lambda i, idx_ref: (0, 0)),
            ],
            out_specs=pl.BlockSpec((1, n3p), lambda i, idx_ref: (0, 0)),
        ),
        compiler_params=pltpu.CompilerParams(
            dimension_semantics=("arbitrary",)),
    )(idx, w1p, b1p, w2p, b2p)

    return out[0, :n3]


def init_params(key, n1, n2, n3):
    """nn.Linear-style init U(-1/sqrt(fan_in), 1/sqrt(fan_in)); weights stored (in, out)."""
    k1, k2, k3, k4 = jax.random.split(key, 4)
    lim1 = 1.0 / jnp.sqrt(jnp.float32(n1))
    lim2 = 1.0 / jnp.sqrt(jnp.float32(n2))
    w1 = jax.random.uniform(k1, (n1, n2), jnp.float32, -lim1, lim1)
    b1 = jax.random.uniform(k2, (n2,), jnp.float32, -lim1, lim1)
    w2 = jax.random.uniform(k3, (n2, n3), jnp.float32, -lim2, lim2)
    b2 = jax.random.uniform(k4, (n3,), jnp.float32, -lim2, lim2)
    return w1, b1, w2, b2


if __name__ == "__main__":
    # FrozenLake-like sizes: 16 states (one-hot), hidden 32, 4 actions.
    n1, n2, n3 = 16, 32, 4

    key = jax.random.PRNGKey(0)
    k_params, k_x = jax.random.split(key)
    w1, b1, w2, b2 = init_params(k_params, n1, n2, n3)
    params = prepare_params(w1, b1, w2, b2)

    # --- single 1-D state vector (the literal PyTorch usage) ---
    state = 3
    x = jnp.zeros((n1,), jnp.float32).at[state].set(1.0)
    probs = jax.block_until_ready(policyparameter_forward(x, params))

    h_ref = jnp.tanh(x @ w1 + b1)
    ref = jax.nn.softmax(h_ref @ w2 + b2, axis=0)   # softmax(dim=0) on 1-D logits
    assert probs.shape == (n3,)
    # kernel uses approx EUP reciprocal (~1e-4 relative error) for the normalize
    assert jnp.allclose(probs, ref, atol=1e-3, rtol=1e-3)
    assert jnp.allclose(jnp.sum(probs), 1.0, atol=2e-3)

    # --- one-hot fast path (scalar-prefetched state index, first matmul skipped) ---
    probs_idx = jax.block_until_ready(policyparameter_forward_onehot(state, params))
    assert probs_idx.shape == (n3,)
    assert jnp.allclose(probs_idx, ref, atol=1e-3, rtol=1e-3)

    # --- batched states: weights resident in VMEM, row tiles stream over the grid ---
    B = 64
    xb = jax.random.normal(k_x, (B, n1), jnp.float32)
    probs_b = jax.block_until_ready(policyparameter_forward(xb, params))

    hb = jnp.tanh(xb @ w1 + b1)
    ref_b = jax.nn.softmax(hb @ w2 + b2, axis=-1)   # per-row over actions
    assert probs_b.shape == (B, n3)
    assert jnp.allclose(probs_b, ref_b, atol=1e-3, rtol=1e-3)

    print("KERNEL_OK")
</pallas_src>

<mosaic_0001>
module attributes {stable_mosaic.version = 11 : i64} {
  func.func @_policy_batched_kernel(%arg0: i32, %arg1: memref<8x16xf32, #tpu.memory_space<vmem>>, %arg2: memref<16x128xf32, #tpu.memory_space<vmem>>, %arg3: memref<1x128xf32, #tpu.memory_space<vmem>>, %arg4: memref<128x128xf32, #tpu.memory_space<vmem>>, %arg5: memref<1x128xf32, #tpu.memory_space<vmem>>, %arg6: memref<8x128xf32, #tpu.memory_space<vmem>>) attributes {dimension_semantics = [#tpu.dimension_semantics<parallel>], iteration_bounds = array<i64: 1>, scalar_prefetch = 0 : i64, scratch_operands = 0 : i64, tpu.core_type = #tpu.core_type<tc>, window_params = [{transform_indices = @transform_0, window_bounds = array<i64: 8, 16>}, {pipeline_mode = #tpu.pipeline_mode<synchronous>, transform_indices = @transform_1, window_bounds = array<i64: 16, 128>}, {pipeline_mode = #tpu.pipeline_mode<synchronous>, transform_indices = @transform_2, window_bounds = array<i64: 1, 128>}, {pipeline_mode = #tpu.pipeline_mode<synchronous>, transform_indices = @transform_3, window_bounds = array<i64: 128, 128>}, {pipeline_mode = #tpu.pipeline_mode<synchronous>, transform_indices = @transform_4, window_bounds = array<i64: 1, 128>}, {transform_indices = @transform_5, window_bounds = array<i64: 8, 128>}]} {
    %c0 = arith.constant 0 : index
    %c0_0 = arith.constant 0 : index
    %0 = vector.load %arg1[%c0, %c0_0] : memref<8x16xf32, #tpu.memory_space<vmem>>, vector<8x16xf32>
    %c0_1 = arith.constant 0 : index
    %c0_2 = arith.constant 0 : index
    %1 = vector.load %arg2[%c0_1, %c0_2] : memref<16x128xf32, #tpu.memory_space<vmem>>, vector<16x128xf32>
    %cst = arith.constant dense<0.000000e+00> : vector<8x128xf32>
    %2 = tpu.matmul %0, %1, %cst {dimension_numbers = #tpu.dot_dimension_numbers<[1], [0], [0], [1], [0, 0, 1, 1], [], []>} : vector<8x16xf32>, vector<16x128xf32>, vector<8x128xf32> -> vector<8x128xf32>
    %c0_3 = arith.constant 0 : index
    %c0_4 = arith.constant 0 : index
    %3 = vector.load %arg3[%c0_3, %c0_4] : memref<1x128xf32, #tpu.memory_space<vmem>>, vector<1x128xf32>
    %4 = vector.broadcast %3 : vector<1x128xf32> to vector<8x128xf32>
    %5 = arith.addf %2, %4 : vector<8x128xf32>
    %6 = math.tanh %5 : vector<8x128xf32>
    %c0_5 = arith.constant 0 : index
    %c0_6 = arith.constant 0 : index
    %7 = vector.load %arg4[%c0_5, %c0_6] : memref<128x128xf32, #tpu.memory_space<vmem>>, vector<128x128xf32>
    %cst_7 = arith.constant dense<0.000000e+00> : vector<8x128xf32>
    %8 = tpu.matmul %6, %7, %cst_7 {dimension_numbers = #tpu.dot_dimension_numbers<[1], [0], [0], [1], [0, 0, 1, 1], [], []>} : vector<8x128xf32>, vector<128x128xf32>, vector<8x128xf32> -> vector<8x128xf32>
    %c0_8 = arith.constant 0 : index
    %c0_9 = arith.constant 0 : index
    %9 = vector.load %arg5[%c0_8, %c0_9] : memref<1x128xf32, #tpu.memory_space<vmem>>, vector<1x128xf32>
    %10 = vector.broadcast %9 : vector<1x128xf32> to vector<8x128xf32>
    %11 = arith.addf %8, %10 : vector<8x128xf32>
    %cst_10 = arith.constant dense<0xFF800000> : vector<8xf32>
    %12 = vector.multi_reduction <maximumf>, %11, %cst_10 [1] : vector<8x128xf32> to vector<8xf32>
    %13 = vector.shape_cast %12 : vector<8xf32> to vector<8x1xf32>
    %14 = vector.broadcast %13 : vector<8x1xf32> to vector<8x128xf32>
    %15 = arith.subf %11, %14 : vector<8x128xf32>
    %16 = math.exp %15 : vector<8x128xf32>
    %cst_11 = arith.constant dense<0.000000e+00> : vector<8xf32>
    %17 = vector.multi_reduction <add>, %16, %cst_11 [1] : vector<8x128xf32> to vector<8xf32>
    %18 = vector.shape_cast %17 : vector<8xf32> to vector<8x1xf32>
    %19 = tpu.reciprocal %18 {approx = true} : vector<8x1xf32> -> vector<8x1xf32>
    %20 = vector.broadcast %19 : vector<8x1xf32> to vector<8x128xf32>
    %21 = arith.mulf %16, %20 : vector<8x128xf32>
    %c0_12 = arith.constant 0 : index
    %c0_13 = arith.constant 0 : index
    %22 = vector.load %arg6[%c0_12, %c0_13] : memref<8x128xf32, #tpu.memory_space<vmem>>, vector<8x128xf32>
    tpu.vector_store %arg6[%c0_12, %c0_13], %21 {strides = array<i32>} : memref<8x128xf32, #tpu.memory_space<vmem>>, vector<8x128xf32>,
    return
  }
  func.func @transform_0(%arg0: i32) -> (i32, i32) {
    %c0_i32 = arith.constant 0 : i32
    %c0_i32_0 = arith.constant 0 : i32
    return %arg0, %c0_i32 : i32, i32
  }
  func.func @transform_1(%arg0: i32) -> (i32, i32) {
    %c0_i32 = arith.constant 0 : i32
    %c0_i32_0 = arith.constant 0 : i32
    %c0_i32_1 = arith.constant 0 : i32
    return %c0_i32, %c0_i32_0 : i32, i32
  }
  func.func @transform_2(%arg0: i32) -> (i32, i32) {
    %c0_i32 = arith.constant 0 : i32
    %c0_i32_0 = arith.constant 0 : i32
    %c0_i32_1 = arith.constant 0 : i32
    return %c0_i32, %c0_i32_0 : i32, i32
  }
  func.func @transform_3(%arg0: i32) -> (i32, i32) {
    %c0_i32 = arith.constant 0 : i32
    %c0_i32_0 = arith.constant 0 : i32
    %c0_i32_1 = arith.constant 0 : i32
    return %c0_i32, %c0_i32_0 : i32, i32
  }
  func.func @transform_4(%arg0: i32) -> (i32, i32) {
    %c0_i32 = arith.constant 0 : i32
    %c0_i32_0 = arith.constant 0 : i32
    %c0_i32_1 = arith.constant 0 : i32
    return %c0_i32, %c0_i32_0 : i32, i32
  }
  func.func @transform_5(%arg0: i32) -> (i32, i32) {
    %c0_i32 = arith.constant 0 : i32
    %c0_i32_0 = arith.constant 0 : i32
    return %arg0, %c0_i32 : i32, i32
  }
}

</mosaic_0001>

<bundles_post_ra>
// kernel: tpu_custom_call.1
= control target key start
LH: loop header
LB: loop body
LE: loop exit
PB: predicated region body
PF: predicated region fallthrough
CT: control target
= control target key end

     0   :  { %10 = vsyncpa [#allocation3], 0  ;;  %s485_s0 = inlined_call_operand.hbm [shape: f32[8,16], index: 0, kind: input, shape index: {}]   ;;  %s486_s1 = inlined_call_operand.hbm [shape: f32[16,128], index: 1, kind: input, shape index: {}]   ;;  %s487_s2 = inlined_call_operand.vmem [shape: f32[1,128], index: 2, kind: input, shape index: {}]   ;;  %s488_s3 = inlined_call_operand.hbm [shape: f32[128,128], index: 3, kind: input, shape index: {}]   ;;  %s489_s4 = inlined_call_operand.vmem [shape: f32[1,128], index: 4, kind: input, shape index: {}]   ;;  %s490_s5 = inlined_call_operand.hbm [shape: f32[8,128], index: 5, kind: output, shape index: {}]  }
   0x1   :  { %11 = vsyncpa [#allocation6], 0 }
   0x2   :  { %12 = vsyncpa [#allocation4], 0  ;;  %s429_s18 = smov [#allocation5]  }
   0x3   :  { %s28_s19 = sshll.u32 %s429_s18, 4  ;;  %s29_s19 = int_to_ptr.vmem [resolvable:$true] %s28_s19 }
   0x4   :  { %s351_s20 = scalar_lea.vmem %s29_s19, 256  ;;  %p356_p1 = scmp.lt.s32.totalorder %s29_s19, %s29_s19 }
   0x5   :  { %p352_p0 = scmp.ne.s32.totalorder %s29_s19, %s351_s20  ;;  %p357_p2 = scmp.lt.s32.totalorder %s351_s20, %s351_s20 }
   0x7   :  { %p358_p3 = por %p357_p2, %p356_p1 }
   0x9   :  { %p359_p4 = pnand %p358_p3, %p352_p0 }
   0xb   :  { %362 = shalt.err (!%p359_p4)
}
   0xc   :  { %s430_s21 = smov 128   ;;  %s431_s22 = smov 8  }
   0xd   :  { %34 = dma.hbm_to_vmem [thread:$0]  %s486_s1, 256, %s29_s19, [#allocation6], %s430_s21, %s430_s21, %s431_s22  }
   0xe   :  { %s432_s25 = smov [#allocation2]   ;;  %s433_s27 = smov [#allocation7]  }
   0xf   :  { %s19_s26 = sshll.u32 %s432_s25, 4  ;;  %s42_s28 = sshll.u32 %s433_s27, 4  ;;  %s20_s26 = int_to_ptr.vmem [resolvable:$true] %s19_s26  ;;  %s43_s28 = int_to_ptr.vmem [resolvable:$true] %s42_s28 }
  0x10   :  { %s371_s29 = scalar_lea.vmem %s20_s26, 128  ;;  %p376_p6 = scmp.lt.s32.totalorder %s20_s26, %s20_s26 }
  0x11   :  { %p372_p5 = scmp.ne.s32.totalorder %s20_s26, %s371_s29  ;;  %p377_p7 = scmp.lt.s32.totalorder %s371_s29, %s371_s29 }
  0x13   :  { %p378_p8 = por %p377_p7, %p376_p6 }
  0x15   :  { %p379_p9 = pnand %p378_p8, %p372_p5 }
  0x17   :  { %382 = shalt.err (!%p379_p9)
}
  0x18   :  { %22 = dma.hbm_to_vmem [thread:$0]  %s485_s0, 128, %s20_s26, [#allocation3]  }
  0x19   :  { %s391_s7 = scalar_lea.vmem %s43_s28, 2048  ;;  %p396_p11 = scmp.lt.s32.totalorder %s43_s28, %s43_s28 }
  0x1a   :  { %p392_p10 = scmp.ne.s32.totalorder %s43_s28, %s391_s7  ;;  %p397_p12 = scmp.lt.s32.totalorder %s391_s7, %s391_s7 }
  0x1c   :  { %p398_p13 = por %p397_p12, %p396_p11 }
  0x1e   :  { %p399_p0 = pnand %p398_p13, %p392_p10 }
  0x20   :  { %402 = shalt.err (!%p399_p0)
}
  0x21   :  { %48 = dma.hbm_to_vmem [thread:$0]  %s488_s3, 2048, %s43_s28, [#allocation6], %s430_s21, %s430_s21, %s431_s22  }
  0x22   :  { %423 = dma.done.wait [#allocation3], 128  }
  0x23   :  { %424 = vsyncadd [#allocation3], 4294967168 }
  0x24   :  { %425 = dma.done.wait [#allocation6], 2304  }
  0x25   :  { %426 = vsyncadd [#allocation6], 4294964992  ;;  %v434_v0 = vmov 0.0   ;;  %vm435_vm0 = vmmov 0   ;;  %v62_v1 = vld [vmem:[#allocation5 + $0x8] sm:$0xff]  ;;  %v61_v2 = vld [vmem:[#allocation5] sm:$0xff] }
  0x26   :  { %287 = vmatprep.subr.mxu0 %v434_v0  ;;  %291 = vmatprep.mubr.msk.f32.mxu0 %vm435_vm0, %v434_v0  ;;  %v60_v3 = vld [vmem:[#allocation2] sm:$0xff]  ;;  %vm70_vm1 = vcmask 130048   ;;  %v160_v4 = vld [vmem:[#allocation7 + $0x78] sm:$0xff]  ;;  %v159_v5 = vld [vmem:[#allocation7 + $0x70] sm:$0xff] }
  0x27   :  { %294 = vmatprep.subr.mxu1 %v434_v0  ;;  %326 = vmatprep.mubr.msk.f32.mxu1 %vm435_vm0, %v434_v0  ;;  %v158_v6 = vld [vmem:[#allocation7 + $0x68] sm:$0xff]  ;;  %v157_v7 = vld [vmem:[#allocation7 + $0x60] sm:$0xff]  ;;  %v156_v8 = vld [vmem:[#allocation7 + $0x58] sm:$0xff] }
  0x28   :  { %288 = vmatpush3.msra.mxu0 %v62_v1  ;;  %295 = vmatpush3.msra.mxu1 %v160_v4  ;;  %v155_v9 = vld [vmem:[#allocation7 + $0x50] sm:$0xff]  ;;  %v154_v10 = vld [vmem:[#allocation7 + $0x48] sm:$0xff]  ;;  %v153_v11 = vld [vmem:[#allocation7 + $0x40] sm:$0xff] }
  0x29   :  { %289 = vmatprep.subr.mxu0 %v434_v0  ;;  %296 = vmatprep.subr.mxu1 %v434_v0  ;;  %v152_v12 = vld [vmem:[#allocation7 + $0x38] sm:$0xff]  ;;  %v151_v13 = vld [vmem:[#allocation7 + $0x30] sm:$0xff]  ;;  %v150_v14 = vld [vmem:[#allocation7 + $0x28] sm:$0xff] }
  0x2a   :  { %290 = vmatpush3.msra.mxu0 %v61_v2  ;;  %297 = vmatpush3.msra.mxu1 %v159_v5  ;;  %v149_v15 = vld [vmem:[#allocation7 + $0x20] sm:$0xff]  ;;  %v148_v16 = vld [vmem:[#allocation7 + $0x18] sm:$0xff]  ;;  %v147_v17 = vld [vmem:[#allocation7 + $0x10] sm:$0xff] }
  0x2b   :  { %292 = vmatmul.mubr.msk.f32.vlgmr.msra.gmra.mxu0 %vm70_vm1, %v60_v3  ;;  %298 = vmatprep.subr.mxu1 %v434_v0  ;;  %v146_v18 = vld [vmem:[#allocation7 + $0x8] sm:$0xff]  ;;  %v145_v19 = vld [vmem:[#allocation7] sm:$0xff] }
  0x2c   :  { %299 = vmatpush3.msra.mxu1 %v158_v6  ;;  %v264_v20 = vld [vmem:[%s487_s2] ss:$0 sm:$0xff]  ;;  %s436_s2 = smov [#allocation8]  }
  0x2d   :  { %300 = vmatprep.subr.mxu1 %v434_v0  ;;  %v266_v25 = vld [vmem:[%s489_s4] ss:$0 sm:$0xff]  ;;  %s254_s11 = sshll.u32 %s436_s2, 4  ;;  %s255_s11 = int_to_ptr.vmem [resolvable:$true] %s254_s11 }
  0x2e   :  { %301 = vmatpush3.msra.mxu1 %v157_v7  ;;  %s403_s12 = scalar_lea.vmem %s255_s11, 128  ;;  %p408_p2 = scmp.lt.s32.totalorder %s255_s11, %s255_s11 }
  0x2f   :  { %302 = vmatprep.subr.mxu1 %v434_v0  ;;  %p404_p1 = scmp.ne.s32.totalorder %s255_s11, %s403_s12  ;;  %p409_p3 = scmp.lt.s32.totalorder %s403_s12, %s403_s12 }
  0x30   :  { %303 = vmatpush3.msra.mxu1 %v156_v8 }
  0x31   :  { %304 = vmatprep.subr.mxu1 %v434_v0  ;;  %p410_p4 = por %p409_p3, %p408_p2 }
  0x32   :  { %305 = vmatpush3.msra.mxu1 %v155_v9 }
  0x33   :  { %306 = vmatprep.subr.mxu1 %v434_v0  ;;  %p411_p5 = pnand %p410_p4, %p404_p1 }
  0x34   :  { %307 = vmatpush3.msra.mxu1 %v154_v10 }
  0x35   :  { %308 = vmatprep.subr.mxu1 %v434_v0 }
  0x36   :  { %309 = vmatpush3.msra.mxu1 %v153_v11 }
  0x37   :  { %310 = vmatprep.subr.mxu1 %v434_v0 }
  0x38   :  { %311 = vmatpush3.msra.mxu1 %v152_v12 }
  0x39   :  { %312 = vmatprep.subr.mxu1 %v434_v0 }
  0x3a   :  { %313 = vmatpush3.msra.mxu1 %v151_v13 }
  0x3b   :  { %314 = vmatprep.subr.mxu1 %v434_v0 }
  0x3c   :  { %315 = vmatpush3.msra.mxu1 %v150_v14 }
  0x3d   :  { %316 = vmatprep.subr.mxu1 %v434_v0 }
  0x3e   :  { %317 = vmatpush3.msra.mxu1 %v149_v15 }
  0x3f   :  { %318 = vmatprep.subr.mxu1 %v434_v0 }
  0x40   :  { %319 = vmatpush3.msra.mxu1 %v148_v16 }
  0x41   :  { %320 = vmatprep.subr.mxu1 %v434_v0 }
  0x42   :  { %321 = vmatpush3.msra.mxu1 %v147_v17 }
  0x43   :  { %322 = vmatprep.subr.mxu1 %v434_v0 }
  0x44   :  { %323 = vmatpush3.msra.mxu1 %v146_v18 }
  0x45   :  { %324 = vmatprep.subr.mxu1 %v434_v0 }
  0x46   :  { %325 = vmatpush3.msra.mxu1 %v145_v19 }
  0xeb   :  { %v140_v21 = vpop.f32.mrf.mxu0 }
  0xec   :  { %v141_v22 = vadd.f32 %v264_v20, %v140_v21 }
  0xed   :  { %v293_v23 = vpop.f32.mrf.mxu0 }
  0xee   :  { %337 = vtanh.f32 %v141_v22 }
  0xfb   :  { %v338_v24 = vpop.eup %337 }
  0xfc   :  { %327 = vmatmul.mubr.f32.vlgmr.msra.gmra.mxu1 %v338_v24 }
 0x1bc   :  { %v234_v26 = vpop.f32.mrf.mxu1 }
 0x1bd   :  { %v235_v27 = vadd.f32 %v266_v25, %v234_v26 }
 0x1be   :  { %v328_v28 = vpop.f32.mrf.mxu1 }
 0x1bf   :  { %238 = vmax.xlane.f32.xlu0 %v235_v27 }
 0x248   :  { %v239_v29 = vpop.xlane.xlu0 %238 }
 0x249   :  { %v240_v30 = vsub.f32 %v235_v27, %v239_v29 }
 0x24b   :  { %v241_v31 = vmul.f32 1.442695, %v240_v30 }
 0x24d   :  { %339 = vpow2.f32 %v241_v31 }
 0x25a   :  { %v340_v32 = vpop.eup %339 }
 0x25b   :  { %243 = vadd.xlane.f32.xlu0 %v340_v32 }
 0x2e4   :  { %v244_v33 = vpop.xlane.xlu0 %243 }
 0x2e5   :  { %341 = vrcp.f32 %v244_v33 }
 0x2f2   :  { %v342_v34 = vpop.eup %341 }
 0x2f3   :  { %v246_v35 = vmul.f32 %v342_v34, %v340_v32 }
 0x2f5   :  { %247 = vst [vmem:[#allocation8] sm:$0xff] %v246_v35 }
 0x2f6   :  { %414 = shalt.err (!%p411_p5)
}
 0x2f7   :  { %257 = dma.vmem_to_hbm [thread:$0]  %s255_s11, 128, %s490_s5, [#allocation4]  }
 0x2f8   :  { %427 = dma.done.wait [#allocation4], 128  }
 0x2f9   :  { %428 = vsyncadd [#allocation4], 4294967168 }
 0x2fa   :  { %261 = vsyncpa [#allocation3], 1 }
 0x2fb   :  { %262 = vsyncpa [#allocation6], 1 }
 0x2fc   :  { %263 = vsyncpa [#allocation4], 1 }

</bundles_post_ra>
